<compile_context>
chip_gen: v5e
topology: v5e:2x2
jax: 0.10.0
libtpu: 0.0.40
codegen_flags: <defaults>
</compile_context>

<pallas_src>
import jax
import jax.numpy as jnp
from jax.experimental import pallas as pl
from jax.experimental.pallas import tpu as pltpu

TIME_SCALAR = 1000.0  # self.time_scalar in FM_TS
LANE = 128


def _fmts_train_loss_kernel(x_ref, z0_ref, t_ref, w1_ref, b1_ref, tw_ref,
                            w2_ref, b2_ref, sse_ref):
    z1 = x_ref[...]                      # (TM, Fp) f32, batch folded into rows
    z0 = z0_ref[...]                     # (TM, Fp) f32, gaussian noise
    t = t_ref[...]                       # (TM, 1)  f32, per-row time

    # flow-matching velocity target + interpolation (FMA-style rewrite)
    target = z1 - z0                     # z1 - z0
    z_t = z0 + t * target                # == t*z1 + (1-t)*z0

    # TODO(synk): the real denoiser is Transformer(n_layer_enc/dec, ...) defined
    # outside the provided module source; substituted with a deterministic
    # time-conditioned MLP (same (B,S,F)->(B,S,F) signature, time via t*1000).
    # bf16 MXU inputs, f32 accumulation; elementwise math stays f32.
    h = jnp.dot(z_t.astype(jnp.bfloat16), w1_ref[...],
                preferred_element_type=jnp.float32)            # (TM, Hp)
    h = h + b1_ref[...] + (t * TIME_SCALAR) * tw_ref[...]
    h = jax.nn.gelu(h, approximate=True)  # tanh approx (PyTorch default is erf)
    out = jnp.dot(h.astype(jnp.bfloat16), w2_ref[...],
                  preferred_element_type=jnp.float32)          # (TM, Fp)
    out = out + b2_ref[...]

    # per-block sum of squared error; padded lanes contribute exactly 0
    diff = out - target
    sse_ref[pl.program_id(0)] = jnp.sum(diff * diff)


def _pick_row_block(rows, max_block=1024):
    """Largest row-block: all rows if they fit, else a multiple-of-8 divisor."""
    if rows <= max_block:
        return rows
    for tm in range(max_block, 7, -8):
        if rows % tm == 0:
            return tm
    return rows  # fallback: single block


def fm_ts_train_loss(x, z0, t, params):
    """Scalar flow-matching training loss (FM_TS.forward / _train_loss)."""
    B, S, F = x.shape
    w1p, b1p, twp, w2p, b2p = params     # already zero-padded to (Fp, Hp) dims
    Fp, Hp = w1p.shape
    rows = B * S

    # Fold batch into rows and make the lane dim 128-dense (zero padding).
    x2d = jnp.pad(x.reshape(rows, F).astype(jnp.float32), ((0, 0), (0, Fp - F)))
    z02d = jnp.pad(z0.reshape(rows, F).astype(jnp.float32), ((0, 0), (0, Fp - F)))
    t_rows = jnp.repeat(t.astype(jnp.float32), S).reshape(rows, 1)

    tm = _pick_row_block(rows)
    nblk = rows // tm

    cost = pl.CostEstimate(
        flops=4 * rows * Fp * Hp,                    # two matmuls
        transcendentals=rows * Hp,                   # gelu tanh
        bytes_accessed=(x2d.size + z02d.size + t_rows.size) * 4
        + (w1p.size + w2p.size) * 2                  # bf16 weights
        + (b1p.size + twp.size + b2p.size) * 4
        + nblk * 4)

    partial_sse = pl.pallas_call(
        _fmts_train_loss_kernel,
        out_shape=jax.ShapeDtypeStruct((nblk,), jnp.float32),
        grid=(nblk,),
        in_specs=[
            pl.BlockSpec((tm, Fp), lambda i: (i, 0)),   # x rows   (B*S, Fp)
            pl.BlockSpec((tm, Fp), lambda i: (i, 0)),   # z0 rows  (B*S, Fp)
            pl.BlockSpec((tm, 1), lambda i: (i, 0)),    # t per row (B*S, 1)
            pl.BlockSpec((Fp, Hp), lambda i: (0, 0)),   # w1 (bf16)
            pl.BlockSpec((1, Hp), lambda i: (0, 0)),    # b1
            pl.BlockSpec((1, Hp), lambda i: (0, 0)),    # tw (time embedding)
            pl.BlockSpec((Hp, Fp), lambda i: (0, 0)),   # w2 (bf16)
            pl.BlockSpec((1, Fp), lambda i: (0, 0)),    # b2
        ],
        out_specs=pl.BlockSpec(memory_space=pltpu.SMEM),  # per-block SSE
        compiler_params=pltpu.CompilerParams(
            dimension_semantics=("parallel",)),           # independent row blocks
        cost_estimate=cost,
    )(x2d, z02d, t_rows, w1p, b1p, twp, w2p, b2p)

    # mean over b of mean over (s,f)  ==  total_SSE / (B*S*F)   (single divide)
    return jnp.sum(partial_sse) * (1.0 / (B * S * F))


if __name__ == "__main__":
    # small shapes consistent with FM_TS: batch=2, seq_length=16, feature_size=8
    B, S, F, H = 2, 16, 8, 32
    Fp = ((F + LANE - 1) // LANE) * LANE   # 128
    Hp = ((H + LANE - 1) // LANE) * LANE   # 128

    key = jax.random.PRNGKey(0)
    kx, kz, kt, k1, k2, k3 = jax.random.split(key, 6)

    # inputs and the random draws _train_loss would sample internally
    # (sampled outside the kernel; statistically equivalent to randn_like/rand)
    x = jax.random.normal(kx, (B, S, F), jnp.float32)    # x_start (b, c=seq, n=feat)
    z0 = jax.random.normal(kz, (B, S, F), jnp.float32)   # randn_like(x_start)
    t = jax.random.uniform(kt, (B,), jnp.float32)        # rand(b,1,1).squeeze()

    # deterministic surrogate-model parameters, zero-padded to lane-dense dims;
    # weights in bf16 (MXU inputs), biases / time embedding in f32.
    w1 = jax.random.normal(k1, (F, H), jnp.float32) * 0.1
    tw = jax.random.normal(k2, (1, H), jnp.float32) * 0.01
    w2 = jax.random.normal(k3, (H, F), jnp.float32) * 0.1

    w1p = jnp.zeros((Fp, Hp), jnp.bfloat16).at[:F, :H].set(w1.astype(jnp.bfloat16))
    b1p = jnp.zeros((1, Hp), jnp.float32)
    twp = jnp.zeros((1, Hp), jnp.float32).at[:, :H].set(tw)
    w2p = jnp.zeros((Hp, Fp), jnp.bfloat16).at[:H, :F].set(w2.astype(jnp.bfloat16))
    b2p = jnp.zeros((1, Fp), jnp.float32)

    loss = jax.jit(fm_ts_train_loss)(x, z0, t, (w1p, b1p, twp, w2p, b2p))
    jax.block_until_ready(loss)
    assert loss.shape == () and bool(jnp.isfinite(loss))
    print("KERNEL_OK")
</pallas_src>

<mosaic_0001>
module attributes {stable_mosaic.version = 11 : i64} {
  func.func @_fmts_train_loss_kernel(%arg0: i32, %arg1: memref<32x128xf32, #tpu.memory_space<vmem>>, %arg2: memref<32x128xf32, #tpu.memory_space<vmem>>, %arg3: memref<32x1xf32, #tpu.memory_space<vmem>>, %arg4: memref<128x128xbf16, #tpu.memory_space<vmem>>, %arg5: memref<1x128xf32, #tpu.memory_space<vmem>>, %arg6: memref<1x128xf32, #tpu.memory_space<vmem>>, %arg7: memref<128x128xbf16, #tpu.memory_space<vmem>>, %arg8: memref<1x128xf32, #tpu.memory_space<vmem>>, %arg9: memref<1xf32, #tpu.memory_space<smem>>) attributes {dimension_semantics = [#tpu.dimension_semantics<parallel>], iteration_bounds = array<i64: 1>, scalar_prefetch = 0 : i64, scratch_operands = 0 : i64, tpu.core_type = #tpu.core_type<tc>, window_params = [{transform_indices = @transform_0, window_bounds = array<i64: 32, 128>}, {transform_indices = @transform_1, window_bounds = array<i64: 32, 128>}, {transform_indices = @transform_2, window_bounds = array<i64: 32, 1>}, {pipeline_mode = #tpu.pipeline_mode<synchronous>, transform_indices = @transform_3, window_bounds = array<i64: 128, 128>}, {pipeline_mode = #tpu.pipeline_mode<synchronous>, transform_indices = @transform_4, window_bounds = array<i64: 1, 128>}, {pipeline_mode = #tpu.pipeline_mode<synchronous>, transform_indices = @transform_5, window_bounds = array<i64: 1, 128>}, {pipeline_mode = #tpu.pipeline_mode<synchronous>, transform_indices = @transform_6, window_bounds = array<i64: 128, 128>}, {pipeline_mode = #tpu.pipeline_mode<synchronous>, transform_indices = @transform_7, window_bounds = array<i64: 1, 128>}, {transform_indices = @transform_8, window_bounds = array<i64: 1>}]} {
    %c0 = arith.constant 0 : index
    %c0_0 = arith.constant 0 : index
    %0 = vector.load %arg1[%c0, %c0_0] : memref<32x128xf32, #tpu.memory_space<vmem>>, vector<32x128xf32>
    %c0_1 = arith.constant 0 : index
    %c0_2 = arith.constant 0 : index
    %1 = vector.load %arg2[%c0_1, %c0_2] : memref<32x128xf32, #tpu.memory_space<vmem>>, vector<32x128xf32>
    %c0_3 = arith.constant 0 : index
    %c0_4 = arith.constant 0 : index
    %2 = vector.load %arg3[%c0_3, %c0_4] : memref<32x1xf32, #tpu.memory_space<vmem>>, vector<32x1xf32>
    %3 = arith.subf %0, %1 : vector<32x128xf32>
    %4 = vector.broadcast %2 : vector<32x1xf32> to vector<32x128xf32>
    %5 = arith.mulf %4, %3 : vector<32x128xf32>
    %6 = arith.addf %1, %5 : vector<32x128xf32>
    %7 = arith.truncf %6 : vector<32x128xf32> to vector<32x128xbf16>
    %c0_5 = arith.constant 0 : index
    %c0_6 = arith.constant 0 : index
    %8 = vector.load %arg4[%c0_5, %c0_6] : memref<128x128xbf16, #tpu.memory_space<vmem>>, vector<128x128xbf16>
    %cst = arith.constant dense<0.000000e+00> : vector<32x128xf32>
    %9 = tpu.matmul %7, %8, %cst {dimension_numbers = #tpu.dot_dimension_numbers<[1], [0], [0], [1], [0, 0, 1, 1], [], []>} : vector<32x128xbf16>, vector<128x128xbf16>, vector<32x128xf32> -> vector<32x128xf32>
    %c0_7 = arith.constant 0 : index
    %c0_8 = arith.constant 0 : index
    %10 = vector.load %arg5[%c0_7, %c0_8] : memref<1x128xf32, #tpu.memory_space<vmem>>, vector<1x128xf32>
    %11 = vector.broadcast %10 : vector<1x128xf32> to vector<32x128xf32>
    %12 = arith.addf %9, %11 : vector<32x128xf32>
    %cst_9 = arith.constant 1.000000e+03 : f32
    %13 = vector.broadcast %cst_9 : f32 to vector<32x1xf32>
    %14 = arith.mulf %2, %13 : vector<32x1xf32>
    %c0_10 = arith.constant 0 : index
    %c0_11 = arith.constant 0 : index
    %15 = vector.load %arg6[%c0_10, %c0_11] : memref<1x128xf32, #tpu.memory_space<vmem>>, vector<1x128xf32>
    %16 = vector.broadcast %14 : vector<32x1xf32> to vector<32x128xf32>
    %17 = vector.broadcast %15 : vector<1x128xf32> to vector<32x128xf32>
    %18 = arith.mulf %16, %17 : vector<32x128xf32>
    %19 = arith.addf %12, %18 : vector<32x128xf32>
    %20 = arith.mulf %19, %19 : vector<32x128xf32>
    %21 = arith.mulf %19, %20 : vector<32x128xf32>
    %cst_12 = arith.constant 4.471500e-02 : f32
    %22 = vector.broadcast %cst_12 : f32 to vector<32x128xf32>
    %23 = arith.mulf %22, %21 : vector<32x128xf32>
    %24 = arith.addf %19, %23 : vector<32x128xf32>
    %cst_13 = arith.constant 0.797884583 : f32
    %25 = vector.broadcast %cst_13 : f32 to vector<32x128xf32>
    %26 = arith.mulf %25, %24 : vector<32x128xf32>
    %27 = math.tanh %26 : vector<32x128xf32>
    %cst_14 = arith.constant 1.000000e+00 : f32
    %28 = vector.broadcast %cst_14 : f32 to vector<32x128xf32>
    %29 = arith.addf %28, %27 : vector<32x128xf32>
    %cst_15 = arith.constant 5.000000e-01 : f32
    %30 = vector.broadcast %cst_15 : f32 to vector<32x128xf32>
    %31 = arith.mulf %30, %29 : vector<32x128xf32>
    %32 = arith.mulf %19, %31 : vector<32x128xf32>
    %33 = arith.truncf %32 : vector<32x128xf32> to vector<32x128xbf16>
    %c0_16 = arith.constant 0 : index
    %c0_17 = arith.constant 0 : index
    %34 = vector.load %arg7[%c0_16, %c0_17] : memref<128x128xbf16, #tpu.memory_space<vmem>>, vector<128x128xbf16>
    %cst_18 = arith.constant dense<0.000000e+00> : vector<32x128xf32>
    %35 = tpu.matmul %33, %34, %cst_18 {dimension_numbers = #tpu.dot_dimension_numbers<[1], [0], [0], [1], [0, 0, 1, 1], [], []>} : vector<32x128xbf16>, vector<128x128xbf16>, vector<32x128xf32> -> vector<32x128xf32>
    %c0_19 = arith.constant 0 : index
    %c0_20 = arith.constant 0 : index
    %36 = vector.load %arg8[%c0_19, %c0_20] : memref<1x128xf32, #tpu.memory_space<vmem>>, vector<1x128xf32>
    %37 = vector.broadcast %36 : vector<1x128xf32> to vector<32x128xf32>
    %38 = arith.addf %35, %37 : vector<32x128xf32>
    %39 = arith.subf %38, %3 : vector<32x128xf32>
    %40 = arith.mulf %39, %39 : vector<32x128xf32>
    %41 = vector.shape_cast %40 : vector<32x128xf32> to vector<1x32x128xf32>
    %cst_21 = arith.constant dense<0.000000e+00> : vector<1xf32>
    %42 = vector.multi_reduction <add>, %41, %cst_21 [1, 2] : vector<1x32x128xf32> to vector<1xf32>
    %43 = vector.shape_cast %42 : vector<1xf32> to vector<1x1x1xf32>
    %44 = vector.extract %43[0, 0, 0] : f32 from vector<1x1x1xf32>
    %45 = arith.index_cast %arg0 : i32 to index
    %46 = memref.load %arg9[%45] : memref<1xf32, #tpu.memory_space<smem>>
    memref.store %44, %arg9[%45] : memref<1xf32, #tpu.memory_space<smem>>
    return
  }
  func.func @transform_0(%arg0: i32) -> (i32, i32) {
    %c0_i32 = arith.constant 0 : i32
    %c0_i32_0 = arith.constant 0 : i32
    return %arg0, %c0_i32 : i32, i32
  }
  func.func @transform_1(%arg0: i32) -> (i32, i32) {
    %c0_i32 = arith.constant 0 : i32
    %c0_i32_0 = arith.constant 0 : i32
    return %arg0, %c0_i32 : i32, i32
  }
  func.func @transform_2(%arg0: i32) -> (i32, i32) {
    %c0_i32 = arith.constant 0 : i32
    %c0_i32_0 = arith.constant 0 : i32
    return %arg0, %c0_i32 : i32, i32
  }
  func.func @transform_3(%arg0: i32) -> (i32, i32) {
    %c0_i32 = arith.constant 0 : i32
    %c0_i32_0 = arith.constant 0 : i32
    %c0_i32_1 = arith.constant 0 : i32
    return %c0_i32, %c0_i32_0 : i32, i32
  }
  func.func @transform_4(%arg0: i32) -> (i32, i32) {
    %c0_i32 = arith.constant 0 : i32
    %c0_i32_0 = arith.constant 0 : i32
    %c0_i32_1 = arith.constant 0 : i32
    return %c0_i32, %c0_i32_0 : i32, i32
  }
  func.func @transform_5(%arg0: i32) -> (i32, i32) {
    %c0_i32 = arith.constant 0 : i32
    %c0_i32_0 = arith.constant 0 : i32
    %c0_i32_1 = arith.constant 0 : i32
    return %c0_i32, %c0_i32_0 : i32, i32
  }
  func.func @transform_6(%arg0: i32) -> (i32, i32) {
    %c0_i32 = arith.constant 0 : i32
    %c0_i32_0 = arith.constant 0 : i32
    %c0_i32_1 = arith.constant 0 : i32
    return %c0_i32, %c0_i32_0 : i32, i32
  }
  func.func @transform_7(%arg0: i32) -> (i32, i32) {
    %c0_i32 = arith.constant 0 : i32
    %c0_i32_0 = arith.constant 0 : i32
    %c0_i32_1 = arith.constant 0 : i32
    return %c0_i32, %c0_i32_0 : i32, i32
  }
  func.func @transform_8(%arg0: i32) -> i32 {
    %c0_i32 = arith.constant 0 : i32
    %c0_i32_0 = arith.constant 0 : i32
    return %c0_i32 : i32
  }
}

</mosaic_0001>

<bundles_post_ra>
// kernel: fm_ts_train_loss.1
= control target key start
LH: loop header
LB: loop body
LE: loop exit
PB: predicated region body
PF: predicated region fallthrough
CT: control target
= control target key end

     0   :  { %v489_v2 = vmov 0   ;;  %s648_s0 = inlined_call_operand.vmem [shape: f32[32,128], index: 0, kind: input, shape index: {}]   ;;  %s649_s1 = inlined_call_operand.vmem [shape: f32[32,128], index: 1, kind: input, shape index: {}]   ;;  %s650_s2 = inlined_call_operand.vmem [shape: f32[32,1], index: 2, kind: input, shape index: {}]   ;;  %s651_s3 = inlined_call_operand.vmem [shape: bf16[128,128], index: 3, kind: input, shape index: {}]   ;;  %s652_s4 = inlined_call_operand.vmem [shape: f32[1,128], index: 4, kind: input, shape index: {}]   ;;  %s653_s5 = inlined_call_operand.vmem [shape: f32[1,128], index: 5, kind: input, shape index: {}]   ;;  %s654_s6 = inlined_call_operand.vmem [shape: bf16[128,128], index: 6, kind: input, shape index: {}]   ;;  %s655_s7 = inlined_call_operand.vmem [shape: f32[1,128], index: 7, kind: input, shape index: {}]   ;;  %s656_s8 = inlined_call_operand.hbm [shape: f32[1], index: 8, kind: output, shape index: {}]  }
   0x1   :  { %v40_v0 = vld [vmem:[%s650_s2 + $0x10] sm:$0xff]  ;;  %v38_v1 = vld [vmem:[%s650_s2] sm:$0xff]  ;;  %462 = vset.pattern.permute.xlu1 %v489_v2  ;;  %461 = vset.pattern.permute.xlu0 %v489_v2  ;;  %v432_v3 = vld [vmem:[%s651_s3 + $0x38] sm:$0xff] }
   0x2   :  { %58 = vperm.xlu0 %461, %v40_v0   ;;  %48 = vperm.xlu1 %462, %v38_v1   ;;  %v431_v4 = vld [vmem:[%s651_s3 + $0x30] sm:$0xff] }
   0x3   :  { %144 = vmatpush.bf16.msra.mxu0 %v432_v3  ;;  %441 = vmatpush.bf16.msra.mxu2 %v432_v3 }
   0x4   :  { %463 = vset.pattern.permute.xlu2 %v489_v2 }
   0x5   :  { %13 = vsyncpa [#allocation3], 0  ;;  %v41_v5 = vld [vmem:[%s650_s2 + $0x18] sm:$0xff]  ;;  %v39_v6 = vld [vmem:[%s650_s2 + $0x8] sm:$0xff]  ;;  %v163_v9 = vmul.f32 1000.0, %v38_v1  ;;  %v165_v15 = vmul.f32 1000.0, %v40_v0 }
   0x6   :  { %v430_v7 = vld [vmem:[%s651_s3 + $0x28] sm:$0xff]  ;;  %v429_v8 = vld [vmem:[%s651_s3 + $0x20] sm:$0xff]  ;;  %v164_v10 = vmul.f32 1000.0, %v39_v6  ;;  %v428_v11 = vld [vmem:[%s651_s3 + $0x18] sm:$0xff]  ;;  %v166_v16 = vmul.f32 1000.0, %v41_v5  ;;  %s351_s15 = sshll.u32 %s656_s8, 4  ;;  %s352_s15 = int_to_ptr.hbm [resolvable:$true] %s351_s15 }
   0x7   :  { %145 = vmatpush.bf16.msra.mxu0 %v431_v4  ;;  %442 = vmatpush.bf16.msra.mxu2 %v431_v4  ;;  %v427_v12 = vld [vmem:[%s651_s3 + $0x10] sm:$0xff]  ;;  %v426_v13 = vld [vmem:[%s651_s3 + $0x8] sm:$0xff]  ;;  %v425_v14 = vld [vmem:[%s651_s3] sm:$0xff]  ;;  %s490_s17 = smov [#allocation2]  }
   0x8   :  { %180 = vperm.xlu2 %463, %v165_v15   ;;  %v30_v17 = vld [vmem:[%s648_s0] sm:$0xff]  ;;  %v32_v20 = vld [vmem:[%s648_s0 + $0x10] sm:$0xff]  ;;  %v33_v24 = vld [vmem:[%s648_s0 + $0x18] sm:$0xff] }
   0x9   :  { %v34_v18 = vld [vmem:[%s649_s1] sm:$0xff]  ;;  %v36_v21 = vld [vmem:[%s649_s1 + $0x10] sm:$0xff]  ;;  %v37_v25 = vld [vmem:[%s649_s1 + $0x18] sm:$0xff] }
   0xa   :  { %63 = vperm.xlu0 %461, %v41_v5   ;;  %53 = vperm.xlu1 %462, %v39_v6   ;;  %v584_v23 = vsub.f32 %v30_v17, %v34_v18  ;;  %v31_v26 = vld [vmem:[%s648_s0 + $0x8] sm:$0xff]  ;;  %v598_v28 = vsub.f32 %v32_v20, %v36_v21  ;;  %v601_v30 = vsub.f32 %v33_v24, %v37_v25  ;;  %v440_v43 = vld [vmem:[%s654_s6 + $0x38] sm:$0xff]  ;;  %v439_v44 = vld [vmem:[%s654_s6 + $0x30] sm:$0xff] }
   0xb   :  { %146 = vmatpush.bf16.msra.mxu0 %v430_v7  ;;  %443 = vmatpush.bf16.msra.mxu2 %v430_v7  ;;  %v35_v27 = vld [vmem:[%s649_s1 + $0x8] sm:$0xff]  ;;  %v437_v46 = vld [vmem:[%s654_s6 + $0x20] sm:$0xff]  ;;  %v436_v47 = vld [vmem:[%s654_s6 + $0x18] sm:$0xff] }
   0xc   :  { %v603_v31 = vsub.f32 %v31_v26, %v35_v27  ;;  %305 = vmatpush.bf16.msra.mxu1 %v440_v43  ;;  %449 = vmatpush.bf16.msra.mxu3 %v440_v43  ;;  %v438_v45 = vld [vmem:[%s654_s6 + $0x28] sm:$0xff]  ;;  %v435_v48 = vld [vmem:[%s654_s6 + $0x10] sm:$0xff]  ;;  %v464_v50 = vld [vmem:[%s653_s5] ss:$0 sm:$0xff] }
   0xd   :  { %v434_v49 = vld [vmem:[%s654_s6 + $0x8] sm:$0xff]  ;;  %v465_v51 = vld [vmem:[%s652_s4] ss:$0 sm:$0xff] }
   0xe   :  { %v433_v53 = vld [vmem:[%s654_s6] sm:$0xff] }
   0xf   :  { %147 = vmatpush.bf16.msra.mxu0 %v429_v8  ;;  %444 = vmatpush.bf16.msra.mxu2 %v429_v8 }
  0x10   :  { %185 = vperm.xlu2 %463, %v166_v16   ;;  %306 = vmatpush.bf16.msra.mxu1 %v439_v44 }
  0x11   :  { %450 = vmatpush.bf16.msra.mxu3 %v439_v44 }
  0x12   :  { %175 = vperm.xlu1 %462, %v164_v10   ;;  %170 = vperm.xlu0 %461, %v163_v9  }
  0x13   :  { %148 = vmatpush.bf16.msra.mxu0 %v428_v11  ;;  %445 = vmatpush.bf16.msra.mxu2 %v428_v11 }
  0x14   :  { %307 = vmatpush.bf16.msra.mxu1 %v438_v45 }
  0x15   :  { %451 = vmatpush.bf16.msra.mxu3 %v438_v45 }
  0x17   :  { %149 = vmatpush.bf16.msra.mxu0 %v427_v12  ;;  %446 = vmatpush.bf16.msra.mxu2 %v427_v12 }
  0x18   :  { %308 = vmatpush.bf16.msra.mxu1 %v437_v46 }
  0x19   :  { %452 = vmatpush.bf16.msra.mxu3 %v437_v46 }
  0x1b   :  { %150 = vmatpush.bf16.msra.mxu0 %v426_v13  ;;  %447 = vmatpush.bf16.msra.mxu2 %v426_v13 }
  0x1c   :  { %309 = vmatpush.bf16.msra.mxu1 %v436_v47 }
  0x1d   :  { %453 = vmatpush.bf16.msra.mxu3 %v436_v47 }
  0x1f   :  { %151 = vmatpush.bf16.msra.mxu0 %v425_v14  ;;  %448 = vmatpush.bf16.msra.mxu2 %v425_v14 }
  0x20   :  { %310 = vmatpush.bf16.msra.mxu1 %v435_v48 }
  0x21   :  { %454 = vmatpush.bf16.msra.mxu3 %v435_v48 }
  0x24   :  { %311 = vmatpush.bf16.msra.mxu1 %v434_v49 }
  0x25   :  { %455 = vmatpush.bf16.msra.mxu3 %v434_v49 }
  0x28   :  { %312 = vmatpush.bf16.msra.mxu1 %v433_v53 }
  0x29   :  { %456 = vmatpush.bf16.msra.mxu3 %v433_v53  ;;  %v466_v53 = vld [vmem:[%s655_s7] ss:$0 sm:$0xff] }
  0x62   :  { %v181_v57 = vpop.permute.xlu2 %180 }
  0x63   :  { %v193_v59 = vmul.f32 %v464_v50, %v181_v57 }
  0x6a   :  { %v186_v9 = vpop.permute.xlu2 %185 }
  0x6b   :  { %v194_v14 = vmul.f32 %v464_v50, %v186_v9 }
  0x74   :  { %v59_v19 = vpop.permute.xlu0 %58  ;;  %v49_v22 = vpop.permute.xlu1 %48 }
  0x75   :  { %v66_v29 = vmul.f32 %v49_v22, %v584_v23  ;;  %v68_v32 = vmul.f32 %v59_v19, %v598_v28 }
  0x77   :  { %v70_v35 = vadd.f32 %v66_v29, %v34_v18  ;;  %v72_v38 = vadd.f32 %v68_v32, %v36_v21 }
  0x7c   :  { %v64_v33 = vpop.permute.xlu0 %63  ;;  %v54_v34 = vpop.permute.xlu1 %53 }
  0x7d   :  { %v69_v36 = vmul.f32 %v64_v33, %v601_v30  ;;  %v67_v37 = vmul.f32 %v54_v34, %v603_v31 }
  0x7f   :  { %v73_v39 = vadd.f32 %v69_v36, %v37_v25  ;;  %v71_v40 = vadd.f32 %v67_v37, %v35_v27 }
  0x81   :  { %v74_v41 = vpack.c.bf16 %v71_v40, %v70_v35  ;;  %v75_v42 = vpack.c.bf16 %v73_v39, %v72_v38 }
  0x83   :  { %152 = vmatmul.bf16.vlgmr.msra.gmra.mxu0 %v74_v41  ;;  %157 = vmatmul.bf16.vlgmr.msra.gmra.mxu2 %v75_v42 }
  0x84   :  { %v171_v52 = vpop.permute.xlu0 %170  ;;  %v176_v61 = vpop.permute.xlu1 %175 }
  0x85   :  { %v191_v55 = vmul.f32 %v464_v50, %v171_v52  ;;  %v192_v2 = vmul.f32 %v464_v50, %v176_v61 }
 0x100   :  { %v153_v54 = vpop.f32.mrf.mxu0 }
 0x101   :  { %v154_v56 = vadd.f32 %v465_v51, %v153_v54 }
 0x103   :  { %v195_v58 = vadd.f32 %v191_v55, %v154_v56 }
 0x105   :  { %v199_v60 = vmul.f32 %v195_v58, %v195_v58 }
 0x106   :  { %v158_v62 = vpop.f32.mrf.mxu2 }
 0x107   :  { %v203_v63 = vmul.f32 %v199_v60, %v195_v58  ;;  %v159_v0 = vadd.f32 %v465_v51, %v158_v62 }
 0x108   :  { %v155_v1 = vpop.f32.mrf.mxu0 }
 0x109   :  { %v197_v3 = vadd.f32 %v193_v59, %v159_v0  ;;  %v156_v4 = vadd.f32 %v465_v51, %v155_v1  ;;  %v207_v5 = vmul.f32 0.044715, %v203_v63 }
 0x10b   :  { %v201_v6 = vmul.f32 %v197_v3, %v197_v3  ;;  %v196_v7 = vadd.f32 %v192_v2, %v156_v4  ;;  %v211_v8 = vadd.f32 %v207_v5, %v195_v58 }
 0x10d   :  { %v205_v10 = vmul.f32 %v201_v6, %v197_v3  ;;  %v200_v11 = vmul.f32 %v196_v7, %v196_v7  ;;  %v215_v12 = vmul.f32 0.7978846, %v211_v8 }
 0x10e   :  { %v160_v13 = vpop.f32.mrf.mxu2 }
 0x10f   :  { %v204_v15 = vmul.f32 %v200_v11, %v196_v7  ;;  %v161_v16 = vadd.f32 %v465_v51, %v160_v13  ;;  %v209_v17 = vmul.f32 0.044715, %v205_v10  ;;  %467 = vtanh.f32 %v215_v12 }
 0x111   :  { %v198_v18 = vadd.f32 %v194_v14, %v161_v16  ;;  %v208_v19 = vmul.f32 0.044715, %v204_v15  ;;  %v213_v20 = vadd.f32 %v209_v17, %v197_v3 }
 0x113   :  { %v202_v21 = vmul.f32 %v198_v18, %v198_v18  ;;  %v212_v22 = vadd.f32 %v208_v19, %v196_v7  ;;  %v217_v24 = vmul.f32 0.7978846, %v213_v20 }
 0x115   :  { %v206_v25 = vmul.f32 %v202_v21, %v198_v18  ;;  %v216_v26 = vmul.f32 0.7978846, %v212_v22  ;;  %469 = vtanh.f32 %v217_v24  ;;  %v468_v27 = vpop.eup %467 }
 0x116   :  { %v223_v33 = vadd.f32 1.0, %v468_v27 }
 0x117   :  { %471 = vtanh.f32 %v216_v26  ;;  %v210_v29 = vmul.f32 0.044715, %v206_v25 }
 0x118   :  { %v227_v38 = vmul.f32 0.5, %v223_v33 }
 0x119   :  { %v214_v32 = vadd.f32 %v210_v29, %v198_v18 }
 0x11a   :  { %v231_v41 = vmul.f32 %v227_v38, %v195_v58 }
 0x11b   :  { %v218_v34 = vmul.f32 0.7978846, %v214_v32  ;;  %v470_v35 = vpop.eup %469 }
 0x11c   :  { %v225_v40 = vadd.f32 1.0, %v470_v35 }
 0x11d   :  { %v472_v36 = vpop.eup %471  ;;  %473 = vtanh.f32 %v218_v34 }
 0x11e   :  { %v224_v37 = vadd.f32 1.0, %v472_v36  ;;  %v229_v46 = vmul.f32 0.5, %v225_v40 }
 0x120   :  { %v228_v39 = vmul.f32 0.5, %v224_v37  ;;  %v233_v48 = vmul.f32 %v229_v46, %v197_v3 }
 0x122   :  { %v232_v42 = vmul.f32 %v228_v39, %v196_v7 }
 0x123   :  { %v474_v43 = vpop.eup %473 }
 0x124   :  { %v235_v44 = vpack.c.bf16 %v232_v42, %v231_v41  ;;  %v226_v45 = vadd.f32 1.0, %v474_v43 }
 0x126   :  { %313 = vmatmul.bf16.vlgmr.msra.gmra.mxu1 %v235_v44  ;;  %v230_v47 = vmul.f32 0.5, %v226_v45 }
 0x128   :  { %v234_v49 = vmul.f32 %v230_v47, %v198_v18 }
 0x12a   :  { %v236_v50 = vpack.c.bf16 %v234_v49, %v233_v48 }
 0x12c   :  { %318 = vmatmul.bf16.vlgmr.msra.gmra.mxu3 %v236_v50 }
 0x1a3   :  { %v314_v51 = vpop.f32.mrf.mxu1 }
 0x1a4   :  { %v315_v56 = vadd.f32 %v466_v53, %v314_v51 }
 0x1a6   :  { %v324_v59 = vsub.f32 %v315_v56, %v584_v23 }
 0x1a8   :  { %v328_v63 = vmul.f32 %v324_v59, %v324_v59 }
 0x1ab   :  { %v316_v52 = vpop.f32.mrf.mxu1 }
 0x1ac   :  { %v317_v54 = vadd.f32 %v466_v53, %v316_v52 }
 0x1ae   :  { %v325_v58 = vsub.f32 %v317_v54, %v603_v31 }
 0x1af   :  { %v319_v55 = vpop.f32.mrf.mxu3 }
 0x1b0   :  { %v320_v57 = vadd.f32 %v466_v53, %v319_v55  ;;  %v329_v61 = vmul.f32 %v325_v58, %v325_v58 }
 0x1b2   :  { %v326_v60 = vsub.f32 %v320_v57, %v598_v28  ;;  %v332_v2 = vadd.f32 %v329_v61, %v328_v63 }
 0x1b4   :  { %v330_v0 = vmul.f32 %v326_v60, %v326_v60 }
 0x1b6   :  { %v333_v5 = vadd.f32 %v332_v2, %v330_v0 }
 0x1b7   :  { %v321_v62 = vpop.f32.mrf.mxu3 }
 0x1b8   :  { %v322_v1 = vadd.f32 %v466_v53, %v321_v62 }
 0x1ba   :  { %v327_v3 = vsub.f32 %v322_v1, %v601_v30 }
 0x1bc   :  { %v331_v4 = vmul.f32 %v327_v3, %v327_v3 }
 0x1be   :  { %v334_v6 = vadd.f32 %v333_v5, %v331_v4 }
 0x1c0   :  { %335 = vadd.xlane.f32.xlu2 %v334_v6 }
 0x233   :  { %v336_v7 = vpop.xlane.xlu2 %335 }
 0x234   :  { %v337_v8 = vrot.slane %v336_v7, 4 }
 0x236   :  { %v338_v9 = vadd.f32 %v337_v8, %v336_v7 }
 0x238   :  { %v339_v31 = vrot.slane %v338_v9, 2 }
 0x23a   :  { %v340_v10 = vadd.f32 %v339_v31, %v338_v9 }
 0x23c   :  { %v341_v23 = vrot.slane %v340_v10, 1 }
 0x23e   :  { %v342_v11 = vadd.f32 %v341_v23, %v340_v10 }
 0x240   :  { %457 = vpush %v342_v11 }
 0x271   :  { %s458_s16 = spop %457 }
 0x272   :  { %345 = sst [smem:[#allocation2]] %s458_s16 }
 0x273   :  { %354 = dma.smem_to_hbm %s490_s17, 16, %s352_s15, [#allocation3]  }
 0x274   :  { %487 = dma.done.wait [#allocation3], 16  }
 0x275   :  { %488 = vsyncadd [#allocation3], 4294967280 }
 0x276   :  { %359 = sfence }
 0x277   :  { %360 = vsyncpa [#allocation3], 1 }

</bundles_post_ra>
